<compile_context>
chip_gen: v6e
topology: v6e:2x2x1
jax: 0.10.0
libtpu: 0.0.40
codegen_flags: <defaults>
</compile_context>

<pallas_src>
import jax
import jax.numpy as jnp
from jax.experimental import pallas as pl
from jax.experimental.pallas import tpu as pltpu

STATE_DIM = 12
ACTION_DIM = 4
NET_DIMS = (32, 32)
NUM_ENSEMBLES = 4
BATCH = 8

_H1, _H2 = NET_DIMS
_FUSED = NUM_ENSEMBLES * _H2                 # 128 lanes = one vreg / MXU tile width
_IN = STATE_DIM + ACTION_DIM

# Packed parameter slab row layout (f32, 128 lanes wide).
# Every logical block starts on an 8-row (sublane-tile) boundary; the three
# vector rows are replicated across a full 8-row tile for broadcast-free loads.
_ROW_WS = 0                                  # rows [ 0, 12) : folded weight, state part
_ROW_WA = 16                                 # rows [16, 20) : folded weight, action part
_ROW_B = 24                                  # rows [24, 32) : folded bias, replicated x8
_ROW_W2 = 32                                 # rows [32, 40) : fused final weight / E, replicated x8
_ROW_B2 = 40                                 # rows [40, 48) : mean(b2)/128 on every lane, replicated x8
_SLAB_ROWS = 48                              # 48 x 128 x 4B = 24 KiB


def critic_ensemble_kernel(state_ref, action_ref, slab_ref, out_ref):
    bt = state_ref.shape[0]                                 # static batch-tile size

    ws = slab_ref[_ROW_WS:_ROW_WS + STATE_DIM, :]           # (12, 128)
    wa = slab_ref[_ROW_WA:_ROW_WA + ACTION_DIM, :]          # (4, 128)

    if bt == 8:
        # Batch tile matches the sublane tile: use the replicated rows directly
        # (full-tile vlds, no broadcast_in_dim / masked sublane loads at all).
        b = slab_ref[_ROW_B:_ROW_B + 8, :]                  # (8, 128)
        w2 = slab_ref[_ROW_W2:_ROW_W2 + 8, :]               # (8, 128)
        b2r = slab_ref[_ROW_B2:_ROW_B2 + 8, :]              # (8, 128)
    else:
        # Large batch tiles: single aligned row + jnp broadcast (cost amortized).
        b = slab_ref[_ROW_B:_ROW_B + 1, :]                  # (1, 128)
        w2 = slab_ref[_ROW_W2:_ROW_W2 + 1, :]               # (1, 128)
        b2r = slab_ref[_ROW_B2:_ROW_B2 + 1, :]              # (1, 128)

    # Encoder + all 4 first decoder layers folded into one lane-dense matmul
    # (split into state/action blocks so no concat is ever materialized).
    z = (jnp.dot(state_ref[...], ws, preferred_element_type=jnp.float32)
         + jnp.dot(action_ref[...], wa, preferred_element_type=jnp.float32)
         + b)                                               # (bt, 128)
    h = jnp.maximum(z, 0.0)                                 # ReLU
    # Final Linear(h2 -> 1) for all ensembles + mean over ensembles + bias mean:
    # one per-lane FMA and one 128-lane reduction.
    out_ref[...] = jnp.sum(h * w2 + b2r, axis=-1, keepdims=True)   # (bt, 1)


def critic_ensemble_forward(state, action, slab, *, block_b=None):
    B = state.shape[0]
    if block_b is None:
        # Big tiles amortize per-grid-step overhead; grid shards across
        # TensorCores (v7x megacore) at realistic batch sizes.
        block_b = B if B <= 512 else 512
    assert B % block_b == 0, "pad the batch to a multiple of block_b"
    assert block_b == B or block_b % 8 == 0
    grid = (B // block_b,)
    return pl.pallas_call(
        critic_ensemble_kernel,
        out_shape=jax.ShapeDtypeStruct((B, 1), jnp.float32),
        grid=grid,
        in_specs=[
            pl.BlockSpec((block_b, STATE_DIM), lambda i: (i, 0)),
            pl.BlockSpec((block_b, ACTION_DIM), lambda i: (i, 0)),
            pl.BlockSpec((_SLAB_ROWS, _FUSED), lambda i: (0, 0)),
        ],
        out_specs=pl.BlockSpec((block_b, 1), lambda i: (i, 0)),
        compiler_params=pltpu.CompilerParams(
            dimension_semantics=("parallel",)),
    )(state, action, slab)


def init_params(key):
    # Deterministic synthetic init in the module's natural layout (orthogonal
    # init of the torch module is not reproduced bit-for-bit; shapes/semantics are).
    ks = jax.random.split(key, 6)
    wenc = jax.random.normal(ks[0], (_IN, _H1), jnp.float32) * 0.1     # encoder weight
    benc = jax.random.normal(ks[1], (_H1,), jnp.float32) * 0.01        # encoder bias
    w1 = jax.random.normal(ks[2], (NUM_ENSEMBLES, _H1, _H2), jnp.float32) * 0.1
    b1 = jax.random.normal(ks[3], (NUM_ENSEMBLES, _H2), jnp.float32) * 0.01
    w2 = jax.random.normal(ks[4], (NUM_ENSEMBLES, _H2), jnp.float32) * 0.05  # (h2->1) weight
    b2 = jnp.full((NUM_ENSEMBLES,), 1e-6, jnp.float32)
    return wenc, benc, w1, b1, w2, b2


def fuse_params(params):
    """Fold the (activation-free) encoder into the ensemble heads and pack into
    one sublane-aligned (48, 128) slab.

    Lane-ordering invariant: w_fused, b_fused and w2_fused all use the same
    (ensemble-major, h2-minor) lane layout produced by reshape of 'iej'/'ej'.
    The ensemble mean relies on this; do not change one without the others.

    Done once host-side (tiny matmuls); if weights change every step this fold
    can live in the JAX wrapper and XLA will fuse it.
    """
    wenc, benc, w1, b1, w2, b2 = params
    e = w1.shape[0]
    assert e * _H2 == _FUSED
    w_fused = jnp.einsum('ih,ehj->iej', wenc, w1).reshape(_IN, _FUSED)      # (16, 128)
    b_fused = (jnp.einsum('h,ehj->ej', benc, w1) + b1).reshape(_FUSED)      # (128,)
    w2_fused = (w2 / e).reshape(_FUSED)                                     # (128,) pre-scaled by 1/E
    b2_lane = jnp.full((_FUSED,), jnp.mean(b2) / _FUSED, jnp.float32)       # sums back to mean(b2)

    slab = jnp.zeros((_SLAB_ROWS, _FUSED), jnp.float32)
    slab = slab.at[_ROW_WS:_ROW_WS + STATE_DIM, :].set(w_fused[:STATE_DIM])
    slab = slab.at[_ROW_WA:_ROW_WA + ACTION_DIM, :].set(w_fused[STATE_DIM:])
    slab = slab.at[_ROW_B:_ROW_B + 8, :].set(jnp.broadcast_to(b_fused, (8, _FUSED)))
    slab = slab.at[_ROW_W2:_ROW_W2 + 8, :].set(jnp.broadcast_to(w2_fused, (8, _FUSED)))
    slab = slab.at[_ROW_B2:_ROW_B2 + 8, :].set(jnp.broadcast_to(b2_lane, (8, _FUSED)))
    return slab


def reference_forward(state, action, params):
    # Pure-JAX mirror of the PyTorch module (un-fused path).
    wenc, benc, w1, b1, w2, b2 = params
    sa = jnp.concatenate([state, action], axis=1)
    t = sa @ wenc + benc                               # encoder Linear, no ReLU
    qs = []
    for i in range(w1.shape[0]):
        h = jnp.maximum(t @ w1[i] + b1[i], 0.0)
        qs.append(h @ w2[i][:, None] + b2[i])          # (B, 1)
    values = jnp.concatenate(qs, axis=-1)              # (B, E)
    return values.mean(axis=-1, keepdims=True)         # (B, 1)


if __name__ == "__main__":
    key = jax.random.PRNGKey(0)
    k_state, k_action, k_params = jax.random.split(key, 3)
    state = jax.random.normal(k_state, (BATCH, STATE_DIM), jnp.float32)
    action = jax.random.normal(k_action, (BATCH, ACTION_DIM), jnp.float32)
    params = init_params(k_params)
    slab = fuse_params(params)                         # one-time packing

    out = critic_ensemble_forward(state, action, slab)
    out = jax.block_until_ready(out)

    ref = reference_forward(state, action, params)
    assert out.shape == (BATCH, 1)
    # Tolerance scaled with output magnitude: the encoder fold reassociates f32
    # math right before the ReLU kink.
    tol = 1e-5 * max(1.0, float(jnp.max(jnp.abs(ref))))
    assert jnp.allclose(out, ref, atol=tol, rtol=1e-4), (out, ref)
    print("KERNEL_OK")
</pallas_src>

<mosaic_0001>
module attributes {stable_mosaic.version = 11 : i64} {
  func.func @critic_ensemble_kernel(%arg0: i32, %arg1: memref<8x12xf32, #tpu.memory_space<vmem>>, %arg2: memref<8x4xf32, #tpu.memory_space<vmem>>, %arg3: memref<48x128xf32, #tpu.memory_space<vmem>>, %arg4: memref<8x1xf32, #tpu.memory_space<vmem>>) attributes {dimension_semantics = [#tpu.dimension_semantics<parallel>], iteration_bounds = array<i64: 1>, scalar_prefetch = 0 : i64, scratch_operands = 0 : i64, tpu.core_type = #tpu.core_type<tc>, window_params = [{transform_indices = @transform_0, window_bounds = array<i64: 8, 12>}, {transform_indices = @transform_1, window_bounds = array<i64: 8, 4>}, {pipeline_mode = #tpu.pipeline_mode<synchronous>, transform_indices = @transform_2, window_bounds = array<i64: 48, 128>}, {transform_indices = @transform_3, window_bounds = array<i64: 8, 1>}]} {
    %c0 = arith.constant 0 : index
    %c0_0 = arith.constant 0 : index
    %0 = vector.load %arg3[%c0, %c0_0] : memref<48x128xf32, #tpu.memory_space<vmem>>, vector<12x128xf32>
    %c16 = arith.constant 16 : index
    %c0_1 = arith.constant 0 : index
    %1 = vector.load %arg3[%c16, %c0_1] : memref<48x128xf32, #tpu.memory_space<vmem>>, vector<4x128xf32>
    %c24 = arith.constant 24 : index
    %c0_2 = arith.constant 0 : index
    %2 = vector.load %arg3[%c24, %c0_2] : memref<48x128xf32, #tpu.memory_space<vmem>>, vector<8x128xf32>
    %c32 = arith.constant 32 : index
    %c0_3 = arith.constant 0 : index
    %3 = vector.load %arg3[%c32, %c0_3] : memref<48x128xf32, #tpu.memory_space<vmem>>, vector<8x128xf32>
    %c40 = arith.constant 40 : index
    %c0_4 = arith.constant 0 : index
    %4 = vector.load %arg3[%c40, %c0_4] : memref<48x128xf32, #tpu.memory_space<vmem>>, vector<8x128xf32>
    %c0_5 = arith.constant 0 : index
    %c0_6 = arith.constant 0 : index
    %5 = vector.load %arg1[%c0_5, %c0_6] : memref<8x12xf32, #tpu.memory_space<vmem>>, vector<8x12xf32>
    %cst = arith.constant dense<0.000000e+00> : vector<8x128xf32>
    %6 = tpu.matmul %5, %0, %cst {dimension_numbers = #tpu.dot_dimension_numbers<[1], [0], [0], [1], [0, 0, 1, 1], [], []>} : vector<8x12xf32>, vector<12x128xf32>, vector<8x128xf32> -> vector<8x128xf32>
    %c0_7 = arith.constant 0 : index
    %c0_8 = arith.constant 0 : index
    %7 = vector.load %arg2[%c0_7, %c0_8] : memref<8x4xf32, #tpu.memory_space<vmem>>, vector<8x4xf32>
    %cst_9 = arith.constant dense<0.000000e+00> : vector<8x128xf32>
    %8 = tpu.matmul %7, %1, %cst_9 {dimension_numbers = #tpu.dot_dimension_numbers<[1], [0], [0], [1], [0, 0, 1, 1], [], []>} : vector<8x4xf32>, vector<4x128xf32>, vector<8x128xf32> -> vector<8x128xf32>
    %9 = arith.addf %6, %8 : vector<8x128xf32>
    %10 = arith.addf %9, %2 : vector<8x128xf32>
    %cst_10 = arith.constant 0.000000e+00 : f32
    %11 = vector.broadcast %cst_10 : f32 to vector<8x128xf32>
    %12 = arith.maximumf %10, %11 : vector<8x128xf32>
    %13 = arith.mulf %12, %3 : vector<8x128xf32>
    %14 = arith.addf %13, %4 : vector<8x128xf32>
    %cst_11 = arith.constant dense<0.000000e+00> : vector<8xf32>
    %15 = vector.multi_reduction <add>, %14, %cst_11 [1] : vector<8x128xf32> to vector<8xf32>
    %16 = vector.shape_cast %15 : vector<8xf32> to vector<8x1xf32>
    %c0_12 = arith.constant 0 : index
    %c0_13 = arith.constant 0 : index
    %17 = vector.load %arg4[%c0_12, %c0_13] : memref<8x1xf32, #tpu.memory_space<vmem>>, vector<8x1xf32>
    tpu.vector_store %arg4[%c0_12, %c0_13], %16 {strides = array<i32>} : memref<8x1xf32, #tpu.memory_space<vmem>>, vector<8x1xf32>,
    return
  }
  func.func @transform_0(%arg0: i32) -> (i32, i32) {
    %c0_i32 = arith.constant 0 : i32
    %c0_i32_0 = arith.constant 0 : i32
    return %arg0, %c0_i32 : i32, i32
  }
  func.func @transform_1(%arg0: i32) -> (i32, i32) {
    %c0_i32 = arith.constant 0 : i32
    %c0_i32_0 = arith.constant 0 : i32
    return %arg0, %c0_i32 : i32, i32
  }
  func.func @transform_2(%arg0: i32) -> (i32, i32) {
    %c0_i32 = arith.constant 0 : i32
    %c0_i32_0 = arith.constant 0 : i32
    %c0_i32_1 = arith.constant 0 : i32
    return %c0_i32, %c0_i32_0 : i32, i32
  }
  func.func @transform_3(%arg0: i32) -> (i32, i32) {
    %c0_i32 = arith.constant 0 : i32
    %c0_i32_0 = arith.constant 0 : i32
    return %arg0, %c0_i32 : i32, i32
  }
}

</mosaic_0001>

<bundles_post_ra>
// kernel: tpu_custom_call.1
= control target key start
LH: loop header
LB: loop body
LE: loop exit
PB: predicated region body
PF: predicated region fallthrough
CT: control target
= control target key end

     0   :  { %8 = vsyncpa [#allocation3], 0  ;;  %s252_s12 = smov [#allocation2]   ;;  %s289_s0 = inlined_call_operand.vmem [shape: f32[8,12], index: 0, kind: input, shape index: {}]   ;;  %s290_s1 = inlined_call_operand.vmem [shape: f32[8,4], index: 1, kind: input, shape index: {}]   ;;  %s291_s2 = inlined_call_operand.hbm [shape: f32[48,128], index: 2, kind: input, shape index: {}]   ;;  %s292_s3 = inlined_call_operand.vmem [shape: f32[8,1], index: 3, kind: output, shape index: {}]  }
   0x1   :  { %s18_s13 = sshll.u32 %s252_s12, 4  ;;  %s19_s13 = int_to_ptr.vmem [resolvable:$true] %s18_s13 }
   0x2   :  { %s238_s14 = scalar_lea.vmem %s19_s13, 768  ;;  %p243_p1 = scmp.lt.s32.totalorder %s19_s13, %s19_s13 }
   0x3   :  { %p239_p0 = scmp.ne.s32.totalorder %s19_s13, %s238_s14  ;;  %p244_p2 = scmp.lt.s32.totalorder %s238_s14, %s238_s14 }
   0x5   :  { %p245_p3 = por %p244_p2, %p243_p1 }
   0x7   :  { %p246_p4 = pnand %p245_p3, %p239_p0 }
   0x9   :  { %249 = shalt.err (!%p246_p4)
}
   0xa   :  { %s253_s15 = smov 128   ;;  %s254_s16 = smov 8  }
   0xb   :  { %24 = dma.hbm_to_vmem [thread:$0]  %s291_s2, 768, %s19_s13, [#allocation3], %s253_s15, %s253_s15, %s254_s16  }
   0xc   :  { %250 = dma.done.wait [#allocation3], 768  }
   0xd   :  { %251 = vsyncadd [#allocation3], 4294966528  ;;  %v255_v0 = vmov 0.0   ;;  %vm256_vm0 = vmmov 0   ;;  %vm40_vm1 = vcmask 1043456   ;;  %vm36_vm2 = vcmask 31744  }
   0xe   :  { %213 = vmatprep.subr.mxu0 %v255_v0  ;;  %218 = vmatprep.subr.mxu1 %v255_v0  ;;  %v30_v1 = vld [vmem:[#allocation2 + $0x10] sm:$0xf]  ;;  %v29_v2 = vld [vmem:[#allocation2 + $0x8] sm:$0xf]  ;;  %v35_v3 = vld [vmem:[%s290_s1] sm:$0xff]  ;;  %vm114_vm3 = vcmask 97280  }
   0xf   :  { %215 = vmatprep.mubr.msk.f32.mxu0 %vm256_vm0, %v255_v0  ;;  %222 = vmatprep.mubr.msk.f32.mxu1 %vm256_vm0, %v255_v0  ;;  %v28_v4 = vld [vmem:[#allocation2] sm:$0xff]  ;;  %v31_v8 = vld [vmem:[#allocation2 + $0x18] sm:$0xff]  ;;  %v33_v15 = vld [vmem:[#allocation2 + $0x28] sm:$0xff]  ;;  %vm197_vm4 = vcmask 7168  }
  0x10   :  { %214 = vmatpush3.msk.msra.mxu0 %vm40_vm1, %v30_v1  ;;  %219 = vmatpush3.msk.msra.mxu1 %vm40_vm1, %v29_v2  ;;  %v34_v5 = vld [vmem:[%s289_s0] sm:$0xff] }
  0x11   :  { %216 = vmatmul.mubr.msk.f32.vlgmr.msra.gmra.mxu0 %vm36_vm2, %v35_v3  ;;  %220 = vmatprep.subr.mxu1 %v255_v0  ;;  %v32_v13 = vld [vmem:[#allocation2 + $0x20] sm:$0xff] }
  0x12   :  { %221 = vmatpush3.msra.mxu1 %v28_v4 }
  0x13   :  { %223 = vmatmul.mubr.msk.f32.vlgmr.msra.gmra.mxu1 %vm114_vm3, %v34_v5 }
  0xd1   :  { %v110_v6 = vpop.f32.mrf.mxu0 }
  0xd3   :  { %v217_v7 = vpop.f32.mrf.mxu0  ;;  %v187_v9 = vpop.f32.mrf.mxu1 }
  0xd4   :  { %v188_v10 = vadd.f32 %v187_v9, %v110_v6 }
  0xd5   :  { %v224_v11 = vpop.f32.mrf.mxu1 }
  0xd6   :  { %v191_v12 = vadd.f32 %v188_v10, %v31_v8 }
  0xd8   :  { %v192_v14 = vmax.f32 %v191_v12, 0.0 }
  0xda   :  { %v193_v16 = vmul.f32 %v192_v14, %v32_v13 }
  0xdc   :  { %v194_v17 = vadd.f32 %v193_v16, %v33_v15 }
  0xde   :  { %195 = vadd.xlane.f32.xlu0 %v194_v17 }
 0x167   :  { %v196_v18 = vpop.xlane.xlu0 %195 }
 0x168   :  { %198 = vst.msk [vmem:[%s292_s3] sm:$0xff] %vm197_vm4, %v196_v18 }
 0x169   :  { %203 = vsyncpa [#allocation3], 1 }

</bundles_post_ra>
